<compile_context>
chip_gen: v7x
topology: tpu7x:2x2x1
jax: 0.10.0
libtpu: 0.0.40
codegen_flags: <defaults>
</compile_context>

<pallas_src>
import jax
import jax.numpy as jnp
from jax.experimental import pallas as pl
from jax.experimental.pallas import tpu as pltpu


def _se_kernel(x_ref, w1_ref, w2_ref, o_ref):
    # x_ref: (1, C, HW) native dtype; w1_ref: (Ch, C); w2_ref: (C, Ch)
    x = x_ref[...]
    hw = x.shape[-1]

    # Squeeze (AdaptiveAvgPool2d(1)): mean over the lane-dense spatial axis,
    # accumulated in f32.
    y = jnp.sum(x.astype(jnp.float32), axis=-1) * (1.0 / hw)          # (1, C)

    # Excitation: Linear(C -> C//r, bias=False) + ReLU.
    # Contract dim 1 of both operands (== y @ W1^T) - no wrapper transpose.
    h = jax.lax.dot_general(
        y, w1_ref[...].astype(jnp.float32),
        dimension_numbers=(((1,), (1,)), ((), ())),
        preferred_element_type=jnp.float32)                           # (1, Ch)
    h = jnp.maximum(h, 0.0)

    # Linear(C//r -> C, bias=False) + Sigmoid.
    s = jax.lax.dot_general(
        h, w2_ref[...].astype(jnp.float32),
        dimension_numbers=(((1,), (1,)), ((), ())),
        preferred_element_type=jnp.float32)                           # (1, C)
    s = jax.nn.sigmoid(s)

    # x * y.expand_as(x): per-channel scale broadcast over the spatial axis.
    # Multiply in f32 vregs (v5e VPU has no bf16), cast on store.
    o_ref[...] = (x.astype(jnp.float32) * s[:, :, None]).astype(o_ref.dtype)


def se_layer(x, w1, w2):
    """SELayer forward.

    x:  (B, C, H, W) in its native dtype (f32 or bf16).
    w1: (C//r, C)  PyTorch nn.Linear weight layout, bias=False.
    w2: (C, C//r)  PyTorch nn.Linear weight layout, bias=False.
    """
    B, C, H, W = x.shape
    HW = H * W
    Ch = w1.shape[0]
    assert w1.shape == (Ch, C) and w2.shape == (C, Ch)

    # Flatten spatial dims (free, contiguous) so H*W is the lane axis.
    x2 = x.reshape(B, C, HW)

    x_itemsize = jnp.dtype(x.dtype).itemsize
    w_bytes = (w1.size * jnp.dtype(w1.dtype).itemsize
               + w2.size * jnp.dtype(w2.dtype).itemsize)
    cost = pl.CostEstimate(
        flops=2 * B * C * HW + 4 * B * C * Ch,      # pool + rescale + 2 tiny FCs
        transcendentals=B * C,                       # sigmoid
        bytes_accessed=2 * B * C * HW * x_itemsize + w_bytes,
    )

    out = pl.pallas_call(
        _se_kernel,
        out_shape=jax.ShapeDtypeStruct((B, C, HW), x.dtype),
        grid=(B,),
        in_specs=[
            pl.BlockSpec((1, C, HW), lambda b: (b, 0, 0)),
            pl.BlockSpec((Ch, C), lambda b: (0, 0)),   # resident weight (DMA'd once)
            pl.BlockSpec((C, Ch), lambda b: (0, 0)),   # resident weight (DMA'd once)
        ],
        out_specs=pl.BlockSpec((1, C, HW), lambda b: (b, 0, 0)),
        compiler_params=pltpu.CompilerParams(
            dimension_semantics=("parallel",),   # batches independent; v7x 2-TC split
            vmem_limit_bytes=48 << 20,           # fits v7x's 64 MiB physical VMEM
        ),
        cost_estimate=cost,
    )(x2, w1, w2)
    # TODO(synk): for very large per-batch planes (C*H*W block > ~VMEM budget),
    # add a spatial-reduction grid axis with a pl.when-gated pooled accumulator.
    return out.reshape(B, C, H, W)


def _se_reference(x, w1, w2):
    # Pure-JAX reference mirroring the PyTorch forward (f32).
    xf = x.astype(jnp.float32)
    y = jnp.mean(xf, axis=(2, 3))                 # (B, C)
    h = jnp.maximum(y @ w1.T, 0.0)                # (B, C//r)
    s = jax.nn.sigmoid(h @ w2.T)                  # (B, C)
    return xf * s[:, :, None, None]


if __name__ == "__main__":
    key = jax.random.PRNGKey(0)
    kx, k1, k2 = jax.random.split(key, 3)

    B, C, H, W = 2, 32, 8, 8
    reduction = 16
    Ch = C // reduction  # 2

    x = jax.random.normal(kx, (B, C, H, W), dtype=jnp.float32)
    # Deterministic synthetic weights (PyTorch Linear layout: (out, in)).
    w1 = jax.random.normal(k1, (Ch, C), dtype=jnp.float32) * (1.0 / jnp.sqrt(C))
    w2 = jax.random.normal(k2, (C, Ch), dtype=jnp.float32) * (1.0 / jnp.sqrt(Ch))

    # f32 path
    out = jax.block_until_ready(se_layer(x, w1, w2))
    ref = _se_reference(x, w1, w2)
    assert out.shape == (B, C, H, W)
    assert out.dtype == jnp.float32
    assert jnp.allclose(out, ref, atol=1e-5, rtol=1e-5)

    # Native bf16 I/O path (no wrapper upcast; f32 accumulation inside kernel).
    x_bf16 = x.astype(jnp.bfloat16)
    out_bf16 = jax.block_until_ready(se_layer(x_bf16, w1, w2))
    ref_bf16 = _se_reference(x_bf16, w1, w2)
    assert out_bf16.dtype == jnp.bfloat16
    assert jnp.allclose(out_bf16.astype(jnp.float32), ref_bf16,
                        atol=5e-2, rtol=5e-2)

    print("KERNEL_OK")
</pallas_src>

<mosaic_0001>
module attributes {stable_mosaic.version = 11 : i64} {
  func.func @_se_kernel(%arg0: i32, %arg1: memref<1x32x64xf32, #tpu.memory_space<vmem>>, %arg2: memref<2x32xf32, #tpu.memory_space<vmem>>, %arg3: memref<32x2xf32, #tpu.memory_space<vmem>>, %arg4: memref<1x32x64xf32, #tpu.memory_space<vmem>>) attributes {dimension_semantics = [#tpu.dimension_semantics<parallel>], iteration_bounds = array<i64: 2>, scalar_prefetch = 0 : i64, scratch_operands = 0 : i64, tpu.core_type = #tpu.core_type<tc>, window_params = [{transform_indices = @transform_0, window_bounds = array<i64: 1, 32, 64>}, {pipeline_mode = #tpu.pipeline_mode<synchronous>, transform_indices = @transform_1, window_bounds = array<i64: 2, 32>}, {pipeline_mode = #tpu.pipeline_mode<synchronous>, transform_indices = @transform_2, window_bounds = array<i64: 32, 2>}, {transform_indices = @transform_3, window_bounds = array<i64: 1, 32, 64>}]} {
    %c0 = arith.constant 0 : index
    %c0_0 = arith.constant 0 : index
    %c0_1 = arith.constant 0 : index
    %0 = vector.load %arg1[%c0, %c0_0, %c0_1] : memref<1x32x64xf32, #tpu.memory_space<vmem>>, vector<1x32x64xf32>
    %cst = arith.constant dense<0.000000e+00> : vector<1x32xf32>
    %1 = vector.multi_reduction <add>, %0, %cst [2] : vector<1x32x64xf32> to vector<1x32xf32>
    %cst_2 = arith.constant 1.562500e-02 : f32
    %2 = vector.broadcast %cst_2 : f32 to vector<1x32xf32>
    %3 = arith.mulf %1, %2 : vector<1x32xf32>
    %c0_3 = arith.constant 0 : index
    %c0_4 = arith.constant 0 : index
    %4 = vector.load %arg2[%c0_3, %c0_4] : memref<2x32xf32, #tpu.memory_space<vmem>>, vector<2x32xf32>
    %cst_5 = arith.constant dense<0.000000e+00> : vector<1x2xf32>
    %5 = tpu.matmul %3, %4, %cst_5 {dimension_numbers = #tpu.dot_dimension_numbers<[1], [1], [0], [0], [0, 0, 1, 0], [], []>} : vector<1x32xf32>, vector<2x32xf32>, vector<1x2xf32> -> vector<1x2xf32>
    %cst_6 = arith.constant 0.000000e+00 : f32
    %6 = vector.broadcast %cst_6 : f32 to vector<1x2xf32>
    %7 = arith.maximumf %5, %6 : vector<1x2xf32>
    %c0_7 = arith.constant 0 : index
    %c0_8 = arith.constant 0 : index
    %8 = vector.load %arg3[%c0_7, %c0_8] : memref<32x2xf32, #tpu.memory_space<vmem>>, vector<32x2xf32>
    %cst_9 = arith.constant dense<0.000000e+00> : vector<1x32xf32>
    %9 = tpu.matmul %7, %8, %cst_9 {dimension_numbers = #tpu.dot_dimension_numbers<[1], [1], [0], [0], [0, 0, 1, 0], [], []>} : vector<1x2xf32>, vector<32x2xf32>, vector<1x32xf32> -> vector<1x32xf32>
    %10 = arith.negf %9 : vector<1x32xf32>
    %11 = math.exp %10 : vector<1x32xf32>
    %cst_10 = arith.constant 1.000000e+00 : f32
    %12 = vector.broadcast %cst_10 : f32 to vector<1x32xf32>
    %13 = arith.addf %12, %11 : vector<1x32xf32>
    %14 = arith.divf %12, %13 : vector<1x32xf32>
    %15 = vector.shape_cast %14 : vector<1x32xf32> to vector<1x32x1xf32>
    %16 = vector.broadcast %15 : vector<1x32x1xf32> to vector<1x32x64xf32>
    %17 = arith.mulf %0, %16 : vector<1x32x64xf32>
    %c0_11 = arith.constant 0 : index
    %c0_12 = arith.constant 0 : index
    %c0_13 = arith.constant 0 : index
    %18 = vector.load %arg4[%c0_11, %c0_12, %c0_13] : memref<1x32x64xf32, #tpu.memory_space<vmem>>, vector<1x32x64xf32>
    tpu.vector_store %arg4[%c0_11, %c0_12, %c0_13], %17 {strides = array<i32>} : memref<1x32x64xf32, #tpu.memory_space<vmem>>, vector<1x32x64xf32>,
    return
  }
  func.func @transform_0(%arg0: i32) -> (i32, i32, i32) {
    %c0_i32 = arith.constant 0 : i32
    %c0_i32_0 = arith.constant 0 : i32
    %c0_i32_1 = arith.constant 0 : i32
    return %arg0, %c0_i32, %c0_i32_0 : i32, i32, i32
  }
  func.func @transform_1(%arg0: i32) -> (i32, i32) {
    %c0_i32 = arith.constant 0 : i32
    %c0_i32_0 = arith.constant 0 : i32
    %c0_i32_1 = arith.constant 0 : i32
    return %c0_i32, %c0_i32_0 : i32, i32
  }
  func.func @transform_2(%arg0: i32) -> (i32, i32) {
    %c0_i32 = arith.constant 0 : i32
    %c0_i32_0 = arith.constant 0 : i32
    %c0_i32_1 = arith.constant 0 : i32
    return %c0_i32, %c0_i32_0 : i32, i32
  }
  func.func @transform_3(%arg0: i32) -> (i32, i32, i32) {
    %c0_i32 = arith.constant 0 : i32
    %c0_i32_0 = arith.constant 0 : i32
    %c0_i32_1 = arith.constant 0 : i32
    return %arg0, %c0_i32, %c0_i32_0 : i32, i32, i32
  }
}

</mosaic_0001>

<bundles_post_ra>
// kernel: tpu_custom_call.1
= control target key start
LH: loop header
LB: loop body
LE: loop exit
PB: predicated region body
PF: predicated region fallthrough
CT: control target
= control target key end

     0   :  { %8 = vsyncpa [#allocation3], 0  ;;  %s978_s0 = inlined_call_operand.hbm [shape: f32[2,32,64], index: 0, kind: input, shape index: {}]   ;;  %s979_s1 = inlined_call_operand.vmem [shape: f32[2,32], index: 1, kind: input, shape index: {}]   ;;  %s980_s2 = inlined_call_operand.vmem [shape: f32[32,2], index: 2, kind: input, shape index: {}]   ;;  %s981_s3 = inlined_call_operand.hbm [shape: f32[2,32,64], index: 3, kind: output, shape index: {}]  }
   0x1   :  { %10 = vsyncpa [#allocation3 + $0x1], 0 }
   0x2   :  { %11 = vsyncpa [#allocation4], 0 }
   0x3   :  { %13 = vsyncpa [#allocation4 + $0x1], 0  ;;  %s768_s12 = smov 0   ;;  %s770_s13 = smov 0  }
   0x4   :  { %s772_s14 = smov 0   ;;  %s774_s15 = smov 0  }
   0x5 LB: > { %s789_s16 = sadd.s32 4294967295, %s737_s15   ;;  %s529_s17 = sadd.s32 4294967294, %s737_s15   ;;  %s737_s15 = sphi %s774_s15, %s994_s15   ;;  %s733_s14 = sphi %s772_s14, %s993_s14   ;;  %s729_s13 = sphi %s770_s13, %s992_s13   ;;  %s725_s12 = sphi %s768_s12, %s991_s12  }
   0x6   : > { %s793_s18 = sadd.s32 1, %s737_s15   ;;  %s26_s19 = sadd.s32 1, %s733_s14 }
   0x7   : > { %s23_s20 = ssub.s32 %s737_s15, %s793_s18  ;;  %p33_p0 = scmp.ne.s32.totalorder %s733_s14, %s729_s13 }
   0x8   : > { %p24_p1 = scmp.eq.s32.totalorder %s23_s20, 0  ;;  %p34_p2 = scmp.eq.s32.totalorder %s737_s15, 0 }
   0x9   : > { %p39_p3 = scmp.ne.s32.totalorder %s729_s13, %s725_s12  ;;  %p40_p4 = scmp.eq.s32.totalorder %s789_s16, 0 }
   0xa   : > { %s805_s21 = scalar_select %p24_p1, %s733_s14, %s26_s19  }
   0xb   : > { %p807_p5 = por %p34_p2, %p33_p0  ;;  %p811_p6 = por %p40_p4, %p39_p3 }
   0xc   : > { %p105_p7 = scmp.eq.s32.totalorder %s789_s16, 1  ;;  %p111_p8 = scmp.eq.s32.totalorder %s529_s17, 1 }
   0xd   : > { %p596_p10 = scmp.lt.s32.totalorder %s737_s15, 2  ;;  %s137_s26 = sand.u32 1, %s733_s14  }
   0xe   : > { %p818_p11 = por %p105_p7, %p33_p0  ;;  %p822_p12 = por %p111_p8, %p39_p3 }
   0xf   : > { %s551_s27 = sshll.u32 %s737_s15, 9  ;;  %s532_s28 = sshll.u32 %s137_s26, 5 }
  0x10   : > { %s985_s24 = scalar_select %p818_p11, 1, 0 }
  0x11   : > { %s986_s25 = scalar_select %p822_p12, 1, 0 }
  0x12   : > { %s831_s4 = scalar_lea.hbm %s978_s0, %s551_s27  ;;  %s141_s5 = scalar_lea.vmem [#allocation2], %s532_s28 }
  0x13   : > { %s148_s6 = sshll.u32 %s141_s5, 4  ;;  %p835_p13 = pnand %p596_p10, %p807_p5  ;;  %s839_s6 = int_to_ptr.vmem [resolvable:$true] %s148_s6 }
  0x14   : > { %s841_s8 = scalar_lea.sflag [#allocation3], %s137_s26  ;;  %s641_s9 = scalar_lea.hbm %s831_s4, 512 }
  0x15   : > { %p642_p0 = scmp.ne.s32.totalorder %s831_s4, %s641_s9  ;;  %p643_p1 = pneg %p835_p13 }
  0x16   : > { %s646_s17 = scalar_lea.hbm %s978_s0, 1024  ;;  %p647_p4 = scmp.lt.u32.totalorder %s831_s4, %s978_s0 }
  0x17   : > { %p644_p2 = pnand %p643_p1, %p642_p0  ;;  %p648_p5 = scmp.lt.u32.totalorder %s646_s17, %s641_s9 }
  0x18   : > { %p650_p8 = scmp.lt.u32.totalorder %s641_s9, %s831_s4 }
  0x19   : > { %p645_p3 = pneg %p644_p2  ;;  %p649_p7 = por %p648_p5, %p647_p4 }
  0x1b   : > { %p651_p10 = por %p650_p8, %p649_p7 }
  0x1d   : > { %p652_p9 = pnand %p651_p10, %p645_p3 }
  0x1f   : > { %655 = shalt.err (!%p652_p9)
}
  0x20   : > { %s656_s22 = scalar_lea.vmem %s839_s6, 512  ;;  %s739_s26 = smov [#allocation2]  }
  0x21   : > { %p657_p0 = scmp.ne.s32.totalorder %s839_s6, %s656_s22  ;;  %s661_s27 = sshll.u32 %s739_s26, 4  ;;  %s662_s27 = int_to_ptr.vmem [resolvable:$false] %s661_s27 }
  0x22   : > { %s663_s28 = scalar_lea.vmem %s662_s27, 1024  ;;  %p664_p11 = scmp.lt.s32.totalorder %s839_s6, %s662_s27 }
  0x23   : > { %p659_p2 = pnand %p657_p0, %p643_p1  ;;  %p665_p4 = scmp.lt.s32.totalorder %s663_s28, %s656_s22 }
  0x25   : > { %p660_p12 = pneg %p659_p2  ;;  %p666_p5 = por %p665_p4, %p664_p11 }
  0x27   : > { %p667_p7 = pnand %p666_p5, %p660_p12 }
  0x29   : > { %670 = shalt.err (!%p667_p7)
}
  0x2a   : > { %s740_s29 = smov 128   ;;  %s741_s30 = smov 8  }
  0x2b   : > { %591 = dma.hbm_to_vmem [thread:$0]  (!%p835_p13), %s831_s4, 512, %s839_s6, %s841_s8, %s740_s29, %s740_s29, %s741_s30  }
  0x2c   : > { %p535_p9 = scmp.ge.s32.totalorder %s737_s15, 1  ;;  %p156_p1 = scmp.lt.s32.totalorder %s737_s15, 3 }
  0x2e   : > { %p157_p3 = pnand %p535_p9, %p156_p1 }
  0x2f   : > { %s872_s5 = sand.u32 (!%p157_p3), 1, %s729_s13  }
  0x30   : > { %160 = sbr.rel (%p157_p3) target bundleno = 805 (0x325), region = 32  ;;  %s536_s9 = sshll.u32 (!%p157_p3), %s872_s5, 5 }
  0x31   : > { %s163_s10 = scalar_lea.sflag (!%p157_p3), [#allocation3], %s872_s5  ;;  %s166_s11 = scalar_lea.vmem (!%p157_p3), [#allocation2], %s536_s9 }
  0x37   : > { %716 = dma.done.wait (%p811_p6), %s163_s10, 512  }
  0x38   : > { %718 = vsyncadd (%p811_p6), %s163_s10, 4294966784  ;;  %vm193_vm0 = vcmask 523264   ;;  %v882_v0 = vld [vmem:[%s166_s11] sm:$0xff]  ;;  %v884_v1 = vld [vmem:[%s166_s11 + $0x10] sm:$0xff]  ;;  %v742_v8 = vmov 0.0   ;;  %vm242_vm1 = vcmask 261120   ;;  %v215_v17 = vlaneseq }
  0x39   : > { %v886_v2 = vld [vmem:[%s166_s11 + $0x8] sm:$0xff]  ;;  %v194_v3 = vsel %vm193_vm0, %v882_v0, 0.0  ;;  %v200_v4 = vsel %vm193_vm0, %v884_v1, 0.0  ;;  %v892_v5 = vld [vmem:[%s166_s11 + $0x18] sm:$0xff]  ;;  %560 = vmatprep.subr.mxu0 %v742_v8  ;;  %v210_v9 = vld [vmem:[%s979_s1] sm:$0x3] }
  0x3a   : > { %195 = vadd.xlane.f32.xlu0 %v194_v3  ;;  %201 = vadd.xlane.f32.xlu1 %v200_v4  ;;  %v197_v6 = vsel %vm193_vm0, %v886_v2, 0.0  ;;  %v203_v7 = vsel %vm193_vm0, %v892_v5, 0.0  ;;  %vm743_vm2 = vmmov 0   ;;  %v319_v10 = vld [vmem:[%s980_s2] sm:$0xff]  ;;  %v320_v11 = vld [vmem:[%s980_s2 + $0x8] sm:$0xff]  ;;  %vm323_vm3 = vcmask 15360  }
  0x3b   : > { %561 = vmatpush3.xpose.msk.msra.mxu0 %vm242_vm1, %v210_v9  ;;  %562 = vmatprep.mubr.msk.f32.mxu0 %vm743_vm2, %v742_v8  ;;  %v744_v12 = vmov 0.0|0.0   ;;  %v577_v13 = vpack.c.bf16 %v320_v11, %v319_v10  ;;  %vm578_vm4 = vmpackc.low %vm323_vm3, %vm323_vm3  ;;  %v321_v14 = vld [vmem:[%s980_s2 + $0x10] sm:$0xff]  ;;  %v322_v15 = vld [vmem:[%s980_s2 + $0x18] sm:$0xff]  ;;  %v216_v18 = vand.u32 127, %v215_v17  ;;  %v218_v19 = vshrl.u32 %v215_v17, 7  ;;  %s188_s27 = scalar_lea.vmem [#allocation5], %s536_s9 }
  0x3c   : > { %573 = vmatprep.mubr.msk.f32.mxu1 %vm743_vm2, %v742_v8  ;;  %576 = vmatprep.subr.bf16.mxu1 %v744_v12  ;;  %v581_v16 = vpack.c.bf16 %v322_v15, %v321_v14  ;;  %vm226_vm5 = vcmask 130112   ;;  %vm233_vm6 = vcmask 195712   ;;  %vm240_vm7 = vcmask 261312   ;;  %s456_s28 = sshll.u32 %s188_s27, 4  ;;  %s552_s29 = sshll.u32 %s789_s16, 9  ;;  %s926_s28 = int_to_ptr.vmem [resolvable:$true] %s456_s28 }
  0x3d   : > { %579 = vmatpush3.bf16.xpose.msk.msra.mxu1 %vm578_vm4, %v577_v13  ;;  %v221_v20 = vadd.s32 4294967288, %v216_v18  ;;  %v235_v21 = vadd.s32 4294967272, %v216_v18  ;;  %v228_v23 = vadd.s32 4294967280, %v216_v18  ;;  %v219_v25 = vsub.s32 %v216_v18, %v218_v19  ;;  %s932_s10 = scalar_lea.hbm %s981_s3, %s552_s29  ;;  %s443_s11 = scalar_lea.sflag [#allocation4], %s872_s5 }
  0x3e   : > { %198 = vadd.xlane.f32.xlu0 %v197_v6  ;;  %204 = vadd.xlane.f32.xlu1 %v203_v7  ;;  %v417_v50 = vsub.s32 0, %v218_v19  ;;  %s671_s23 = scalar_lea.vmem %s926_s28, 512  ;;  %p988_p11 = scmp.ne.s32.totalorder %s985_s24, 0 }
  0x3f   : > { %580 = vmatprep.subr.bf16.mxu1 %v744_v12  ;;  %v224_v27 = vsub.s32 %v221_v20, %v218_v19  ;;  %v238_v28 = vsub.s32 %v235_v21, %v218_v19  ;;  %v231_v29 = vsub.s32 %v228_v23, %v218_v19  ;;  %p672_p6 = scmp.ne.s32.totalorder %s926_s28, %s671_s23  ;;  %s745_s16 = smov [#allocation5]  }
  0x40   : > { %s675_s4 = sshll.u32 %s745_s16, 4  ;;  %s676_s4 = int_to_ptr.vmem [resolvable:$false] %s675_s4 }
  0x41   : > { %p673_p12 = pnand %p672_p6, %p988_p11  ;;  %s677_s6 = scalar_lea.vmem %s676_s4, 1024 }
  0x42   : > { %p678_p8 = scmp.lt.s32.totalorder %s926_s28, %s676_s4  ;;  %p679_p10 = scmp.lt.s32.totalorder %s677_s6, %s671_s23 }
  0x43   : > { %p674_p13 = pneg %p673_p12 }
  0x44   : > { %p680_p0 = por %p679_p10, %p678_p8 }
  0x45   : > { %583 = vmatpush3.bf16.xpose.msk.msra.mxu1 %vm578_vm4, %v581_v16 }
  0x46   : > { %p681_p2 = pnand %p680_p0, %p674_p13 }
  0xc7   : > { %v196_v22 = vpop.xlane.xlu0 %195  ;;  %v202_v24 = vpop.xlane.xlu1 %201 }
  0xc8   : > { %v206_v26 = vmul.f32 0.015625, %v196_v22  ;;  %v208_v30 = vmul.f32 0.015625, %v202_v24 }
  0xca   : > { %v220_v35 = vrot.slane %v206_v26, %v219_v25  ;;  %v232_v38 = vrot.slane %v208_v30, %v231_v29 }
  0xcb   : > { %v199_v31 = vpop.xlane.xlu0 %198  ;;  %v205_v32 = vpop.xlane.xlu1 %204 }
  0xcc   : > { %v207_v33 = vmul.f32 0.015625, %v199_v31  ;;  %v209_v34 = vmul.f32 0.015625, %v205_v32 }
  0xce   : > { %v225_v36 = vrot.slane %v207_v33, %v224_v27  ;;  %v239_v37 = vrot.slane %v209_v34, %v238_v28 }
  0xd0   : > { %v227_v39 = vsel %vm226_vm5, %v225_v36, %v220_v35 }
  0xd1   : > { %v234_v40 = vsel %vm233_vm6, %v232_v38, %v227_v39 }
  0xd2   : > { %v241_v41 = vsel %vm240_vm7, %v239_v37, %v234_v40 }
  0xd3   : > { %563 = vmatmul.mubr.msk.f32.vlgmr.msra.gmra.mrb[0].mxu0 %vm242_vm1, %v241_v41 }
 0x1a6   : > { %v314_v42 = vpop.f32.mrb[0].mxu0 }
 0x1a7   : > { %v318_v43 = vmax.f32 %v314_v42, 0.0  ;;  %v564_v44 = vpop.f32.mrb[1].mxu0 }
 0x1a9   : > { %574 = vmatmul.mubr.msk.f32.vlgmr.msra.gmra.mrb[0].mxu1 %vm323_vm3, %v318_v43 }
 0x27c   : > { %v405_v45 = vpop.f32.mrb[0].mxu1 }
 0x27d   : > { %v545_v46 = vmul.f32 -1.442695, %v405_v45  ;;  %v575_v47 = vpop.f32.mrb[1].mxu1 }
 0x27f   : > { %637 = vpow2.f32 %v545_v46 }
 0x289   : > { %v638_v48 = vpop.eup %637 }
 0x28a   : > { %v412_v49 = vadd.f32 1.0, %v638_v48 }
 0x28c   : > { %639 = vrcp.f32 %v412_v49 }
 0x296   : > { %v640_v51 = vpop.eup %639 }
 0x297   : > { %v418_v52 = vrot.slane %v640_v51, %v417_v50 }
 0x299   : > { %424 = vbcast.lane.b32.xlu1 %v418_v52, 264  ;;  %420 = vbcast.lane.b32.xlu0 %v418_v52, 256 }
 0x29d   : > { %428 = vbcast.lane.b32.xlu1 %v418_v52, 272 }
 0x2a1   : > { %432 = vbcast.lane.b32.xlu1 %v418_v52, 280 }
 0x30b   : > { %v425_v53 = vpop.permute.xlu1 %424  ;;  %v421_v54 = vpop.permute.xlu0 %420 }
 0x30c   : > { %v435_v55 = vmul.f32 %v425_v53, %v886_v2  ;;  %v434_v56 = vmul.f32 %v421_v54, %v882_v0 }
 0x30e   : > { %439 = vst.msk [vmem:[%s188_s27 + $0x8] sm:$0xff] %vm193_vm0, %v435_v55  ;;  %438 = vst.msk [vmem:[%s188_s27] sm:$0xff] %vm193_vm0, %v434_v56 }
 0x30f   : > { %v429_v57 = vpop.permute.xlu1 %428 }
 0x310   : > { %v436_v58 = vmul.f32 %v429_v57, %v884_v1 }
 0x312   : > { %440 = vst.msk [vmem:[%s188_s27 + $0x10] sm:$0xff] %vm193_vm0, %v436_v58 }
 0x313   : > { %v433_v59 = vpop.permute.xlu1 %432 }
 0x314   : > { %v437_v60 = vmul.f32 %v433_v59, %v892_v5 }
 0x316   : > { %441 = vst.msk [vmem:[%s188_s27 + $0x18] sm:$0xff] %vm193_vm0, %v437_v60 }
 0x317   : > { %684 = shalt.err (!%p681_p2)
}
 0x318   : > { %s685_s7 = scalar_lea.hbm %s932_s10, 512  ;;  %s689_s19 = scalar_lea.hbm %s981_s3, 1024 }
 0x319   : > { %p686_p4 = scmp.ne.s32.totalorder %s932_s10, %s685_s7  ;;  %p690_p9 = scmp.lt.u32.totalorder %s932_s10, %s981_s3 }
 0x31a   : > { %p691_p1 = scmp.lt.u32.totalorder %s689_s19, %s685_s7  ;;  %p693_p6 = scmp.lt.u32.totalorder %s685_s7, %s932_s10 }
 0x31b   : > { %p687_p5 = pnand %p686_p4, %p988_p11 }
 0x31c   : > { %p692_p3 = por %p691_p1, %p690_p9 }
 0x31d   : > { %p688_p7 = pneg %p687_p5 }
 0x31e   : > { %p694_p12 = por %p693_p6, %p692_p3 }
 0x320   : > { %p695_p13 = pnand %p694_p12, %p688_p7 }
 0x322   : > { %698 = shalt.err (!%p695_p13)
}
 0x323   : > { %s746_s26 = smov 128   ;;  %s747_s27 = smov 8  }
 0x324   : > { %586 = dma.vmem_to_hbm [thread:$0]  (%p988_p11), %s926_s28, 512, %s932_s10, %s443_s11, %s746_s26, %s746_s26, %s747_s27  }
 0x325 PF: > { %s471_s29 = sand.u32 1, %s725_s12   ;;  %p989_p8 = scmp.ne.s32.totalorder %s986_s25, 0 }
 0x326   : > { %p990_p10 = scmp.ge.s32.totalorder %s737_s15, 2  ;;  %s472_s30 = scalar_lea.sflag [#allocation4], %s471_s29 }
 0x328   : > { %p593_p0 = pnand %p990_p10, %p989_p8 }
 0x32a   : > { %720 = dma.done.wait (!%p593_p0), %s472_s30, 512  }
 0x32b   : > { %722 = vsyncadd (!%p593_p0), %s472_s30, 4294966784  ;;  %p16_p2 = scmp.ge.s32.totalorder %s793_s18, 4   ;;  %s991_s12 = smov %s729_s13 }
 0x32c   : > { %s992_s13 = smov %s733_s14  ;;  %s993_s14 = smov %s805_s21 }
 0x32d   : > { %s994_s15 = smov %s793_s18  ;;  %18 = sbr.rel (!%p16_p2) target bundleno = 5 (0x5), region = 77 }
 0x334   :  { %477 = vsyncpa [#allocation3], 1 }
 0x335   :  { %479 = vsyncpa [#allocation3 + $0x1], 1 }
 0x336   :  { %480 = vsyncpa [#allocation4], 1 }
 0x337   :  { %482 = vsyncpa [#allocation4 + $0x1], 1 }

</bundles_post_ra>
